<compile_context>
chip_gen: v7x
topology: tpu7x:2x2x1
jax: 0.10.0
libtpu: 0.0.40
codegen_flags: <defaults>
</compile_context>

<pallas_src>
import functools

import jax
import jax.numpy as jnp
from jax.experimental import pallas as pl
from jax.experimental.pallas import tpu as pltpu


def _round_up(x, m):
    return (x + m - 1) // m * m


def _cdiv(a, b):
    return -(-a // b)


# ----------------------------------------------------------------------------
# Fused MLP kernel.  refs = (x_ref, w0, b0, w1, b1, ..., wL, bL, o_ref)
#   x_ref : (TILE_B, in_dim)    f32 (cast to compute dtype in-kernel)
#   w_i   : (in_i,  out_i_pad)  bf16 (out dims padded to 128-lane multiples)
#   b_i   : (1,     out_i_pad)  f32
#   o_ref : (TILE_B, out_pad)   out_dtype
# ----------------------------------------------------------------------------
def _mlp_kernel(*refs, num_hidden, activation, compute_dtype, num_chunks):
    x_ref, o_ref = refs[0], refs[-1]
    wb = refs[1:-1]
    tb = x_ref.shape[0]
    rows = tb // num_chunks
    act = (lambda v: jnp.maximum(v, 0.0)) if activation == "relu" else jnp.tanh

    # Split the batch tile into independent sub-chunks so the MXU matmul of
    # chunk c+1 can overlap the EUP/VPU activation epilogue of chunk c.
    chunks = [x_ref[c * rows:(c + 1) * rows, :].astype(compute_dtype)
              for c in range(num_chunks)]
    for layer in range(num_hidden + 1):
        w = wb[2 * layer][...]                       # (in, out_pad) bf16
        b = wb[2 * layer + 1][...]                   # (1, out_pad)  f32
        ys = [jnp.dot(chunks[c], w, preferred_element_type=jnp.float32) + b
              for c in range(num_chunks)]            # f32 MXU accumulation
        if layer < num_hidden:                       # hidden layer: activation
            chunks = [act(y).astype(compute_dtype) for y in ys]
        else:                                        # output layer: linear
            chunks = ys
    for c in range(num_chunks):
        o_ref[c * rows:(c + 1) * rows, :] = chunks[c].astype(o_ref.dtype)


# ----------------------------------------------------------------------------
# Parameter construction (deterministic).  Mirrors NeuralNetTorch.__init__
# shapes and the xavierIn initializer (xavier-normal weights, bias = 0.01).
# Weights are stored transposed as (in_features, out_features) so the kernel
# computes  y = x @ W + b  (== PyTorch's x @ W_pt.T + b_pt).
# ----------------------------------------------------------------------------
def init_params(key, input_size, hidden_layers, hidden_size, output_size):
    params = []
    dims = [input_size] + [hidden_size] * hidden_layers
    for i in range(hidden_layers):
        fan_in, fan_out = dims[i], dims[i + 1]
        key, sub = jax.random.split(key)
        std = (2.0 / (fan_in + fan_out)) ** 0.5      # xavier-normal, gain=1
        w = std * jax.random.normal(sub, (fan_in, fan_out), dtype=jnp.float32)
        b = jnp.full((1, fan_out), 0.01, dtype=jnp.float32)
        params.append((w, b))
    key, sub = jax.random.split(key)
    std = (2.0 / (hidden_size + output_size)) ** 0.5
    w_out = std * jax.random.normal(sub, (hidden_size, output_size), dtype=jnp.float32)
    b_out = jnp.full((1, output_size), 0.01, dtype=jnp.float32)
    params.append((w_out, b_out))
    return params


def _prepare_params(params, param_dtype=jnp.bfloat16):
    """Pad weight/bias out dims to 128-lane multiples and cast W to param_dtype.

    Layer 0 keeps its un-padded input dim so x can be passed to the kernel
    without a wrapper-side pad/cast copy.
    """
    prepped = []
    for idx, (w, b) in enumerate(params):
        fi, fo = w.shape
        fip = fi if idx == 0 else _round_up(fi, 128)
        fop = _round_up(fo, 128)
        wp = jnp.zeros((fip, fop), param_dtype).at[:fi, :fo].set(w.astype(param_dtype))
        bp = jnp.zeros((1, fop), jnp.float32).at[:, :fo].set(b.astype(jnp.float32))
        prepped.append((wp, bp))
    return prepped


def _choose_batch_tiles(batch, tile_b):
    """Adaptive batch tiling: big tiles, 16-row granularity, minimal padding,
    and >=2 grid steps (when tiles stay >=128 rows) for v7x's two TCs."""
    tb = max(16, _round_up(min(tile_b, batch), 16))
    nt = _cdiv(batch, tb)
    while nt < 2 and tb >= 256:
        tb //= 2
        nt = _cdiv(batch, tb)
    tb = max(16, _round_up(_cdiv(batch, nt), 16))    # shrink dead rows in last tile
    nt = _cdiv(batch, tb)
    return tb, nt, nt * tb


def _vmem_capacity_bytes():
    try:
        return int(pltpu.get_tpu_info().vmem_capacity_bytes)
    except Exception:
        return 64 * 1024 * 1024                      # conservative (v7x)


def _fused_mlp_call(prepped, x_in, *, active_func, out_dtype, tb, num_tiles,
                    num_chunks, single_buffer_weights):
    b_pad, in_dim = x_in.shape
    num_hidden = len(prepped) - 1
    out_pad = prepped[-1][0].shape[1]
    max_pad = max(wp.shape[1] for wp, _ in prepped)

    # Resident weights/biases: constant index_map; single-buffer when supported
    # (no re-DMA ever happens, so the second buffer is pure VMEM waste).
    wkw = {"pipeline_mode": pl.Buffered(1)} if single_buffer_weights else {}
    in_specs = [pl.BlockSpec((tb, in_dim), lambda i: (i, 0))]   # x: tiled, double-buffered
    flat_inputs = [x_in]
    for wp, bp in prepped:
        in_specs.append(pl.BlockSpec(wp.shape, lambda i: (0, 0), **wkw))
        in_specs.append(pl.BlockSpec(bp.shape, lambda i: (0, 0), **wkw))
        flat_inputs += [wp, bp]

    # --- VMEM budget (generation-aware, counts actual buffers) ---------------
    wbuf = 1 if single_buffer_weights else 2
    weight_bytes = sum(wp.size * wp.dtype.itemsize + 8 * bp.shape[1] * 4
                       for wp, bp in prepped) * wbuf
    tile_bytes = 2 * (tb * in_dim * x_in.dtype.itemsize            # x tile, 2 bufs
                      + tb * out_pad * jnp.dtype(out_dtype).itemsize)  # out tile, 2 bufs
    act_bytes = 3 * tb * max_pad * 4                 # live f32 intermediates in-kernel
    est = weight_bytes + tile_bytes + act_bytes + (2 << 20)
    cap = min(int(_vmem_capacity_bytes() * 0.875), 100 << 20)
    vmem_limit = int(min(cap, max(32 << 20, est)))
    # TODO(synk): stream weight blocks (extra grid axis / pltpu.emit_pipeline)
    # when resident weights exceed ~75% of VMEM capacity (matters on v7x 64 MiB).

    kernel = functools.partial(_mlp_kernel, num_hidden=num_hidden,
                               activation=active_func,
                               compute_dtype=prepped[0][0].dtype,
                               num_chunks=num_chunks)
    return pl.pallas_call(
        kernel,
        out_shape=jax.ShapeDtypeStruct((b_pad, out_pad), out_dtype),
        grid=(num_tiles,),
        in_specs=in_specs,
        out_specs=pl.BlockSpec((tb, out_pad), lambda i: (i, 0)),
        compiler_params=pltpu.CompilerParams(
            dimension_semantics=("parallel",),       # megacore / v7x 2-TC sharding
            vmem_limit_bytes=vmem_limit,
        ),
    )(*flat_inputs)


# ----------------------------------------------------------------------------
# Forward pass == NeuralNetTorch.forward:
#   for ly in hidLayer: x = activation(Linear(x))
#   return outLayer(x)            # no activation on the output layer
# ----------------------------------------------------------------------------
def neural_net_forward(params, x, active_func="tanh", tile_b=512,
                       param_dtype=jnp.bfloat16, out_dtype=jnp.float32):
    batch, in_dim = x.shape
    out_dim = params[-1][0].shape[1]

    prepped = _prepare_params(params, param_dtype)
    tb, num_tiles, b_pad = _choose_batch_tiles(batch, tile_b)
    num_chunks = 2 if tb >= 32 else 1

    # x is passed as-is (f32) and cast inside the kernel; only the batch dim is
    # zero-padded, and only when the tile layout needs it.
    x_in = x if b_pad == batch else jnp.pad(x, ((0, b_pad - batch), (0, 0)))

    call = functools.partial(_fused_mlp_call, prepped, x_in,
                             active_func=active_func, out_dtype=out_dtype,
                             tb=tb, num_tiles=num_tiles, num_chunks=num_chunks)
    try:
        out_p = call(single_buffer_weights=True)
    except Exception:
        # pl.Buffered(1) / pipeline_mode unsupported on this jax build: fall
        # back to default double-buffered resident weights (same semantics).
        out_p = call(single_buffer_weights=False)

    out_pad = prepped[-1][0].shape[1]
    if b_pad == batch and out_pad == out_dim:
        return out_p
    return out_p[:batch, :out_dim]


# Pure-JAX f32 reference (PyTorch semantics) for correctness check.
def neural_net_forward_ref(params, x, active_func="tanh"):
    act = (lambda v: jnp.maximum(v, 0.0)) if active_func == "relu" else jnp.tanh
    *hidden, out = params
    for w, b in hidden:
        x = act(x @ w + b)
    w_out, b_out = out
    return x @ w_out + b_out


if __name__ == "__main__":
    # Small shapes consistent with the module's forward.
    batch = 8
    input_size = 16
    hidden_layers = 2
    hidden_size = 32
    output_size = 4

    key = jax.random.PRNGKey(0)
    key, pkey, xkey = jax.random.split(key, 3)

    params = init_params(pkey, input_size, hidden_layers, hidden_size, output_size)
    x = jax.random.normal(xkey, (batch, input_size), dtype=jnp.float32)

    # tanh path (module default)
    out = jax.block_until_ready(neural_net_forward(params, x, active_func="tanh"))
    ref = neural_net_forward_ref(params, x, active_func="tanh")
    assert out.shape == (batch, output_size)
    # bf16 matmul inputs with f32 accumulation -> loose tolerance vs f32 ref.
    assert jnp.allclose(out, ref, atol=5e-2, rtol=5e-2), "tanh path mismatch vs reference"

    # relu path (module's activeFunc='relu' branch)
    out_r = jax.block_until_ready(neural_net_forward(params, x, active_func="relu"))
    ref_r = neural_net_forward_ref(params, x, active_func="relu")
    assert jnp.allclose(out_r, ref_r, atol=5e-2, rtol=5e-2), "relu path mismatch vs reference"

    # Ragged batch: exercises adaptive tiling, the 2-step "parallel" grid and
    # the in-kernel MXU/EUP chunk overlap.
    key, xkey2 = jax.random.split(key)
    x_big = jax.random.normal(xkey2, (300, input_size), dtype=jnp.float32)
    out_b = jax.block_until_ready(neural_net_forward(params, x_big, active_func="tanh"))
    ref_b = neural_net_forward_ref(params, x_big, active_func="tanh")
    assert out_b.shape == (300, output_size)
    assert jnp.allclose(out_b, ref_b, atol=5e-2, rtol=5e-2), "ragged-batch mismatch vs reference"

    print("KERNEL_OK")
</pallas_src>

<mosaic_0001>
module attributes {stable_mosaic.version = 11 : i64} {
  func.func @_mlp_kernel(%arg0: i32, %arg1: memref<16x16xf32, #tpu.memory_space<vmem>>, %arg2: memref<16x128xbf16, #tpu.memory_space<vmem>>, %arg3: memref<1x128xf32, #tpu.memory_space<vmem>>, %arg4: memref<128x128xbf16, #tpu.memory_space<vmem>>, %arg5: memref<1x128xf32, #tpu.memory_space<vmem>>, %arg6: memref<128x128xbf16, #tpu.memory_space<vmem>>, %arg7: memref<1x128xf32, #tpu.memory_space<vmem>>, %arg8: memref<16x128xf32, #tpu.memory_space<vmem>>) attributes {dimension_semantics = [#tpu.dimension_semantics<parallel>], iteration_bounds = array<i64: 1>, scalar_prefetch = 0 : i64, scratch_operands = 0 : i64, tpu.core_type = #tpu.core_type<tc>, window_params = [{transform_indices = @transform_0, window_bounds = array<i64: 16, 16>}, {pipeline_mode = #tpu.pipeline_mode<synchronous>, transform_indices = @transform_1, window_bounds = array<i64: 16, 128>}, {pipeline_mode = #tpu.pipeline_mode<synchronous>, transform_indices = @transform_2, window_bounds = array<i64: 1, 128>}, {pipeline_mode = #tpu.pipeline_mode<synchronous>, transform_indices = @transform_3, window_bounds = array<i64: 128, 128>}, {pipeline_mode = #tpu.pipeline_mode<synchronous>, transform_indices = @transform_4, window_bounds = array<i64: 1, 128>}, {pipeline_mode = #tpu.pipeline_mode<synchronous>, transform_indices = @transform_5, window_bounds = array<i64: 128, 128>}, {pipeline_mode = #tpu.pipeline_mode<synchronous>, transform_indices = @transform_6, window_bounds = array<i64: 1, 128>}, {transform_indices = @transform_7, window_bounds = array<i64: 16, 128>}]} {
    %c0 = arith.constant 0 : index
    %c0_0 = arith.constant 0 : index
    %0 = vector.load %arg1[%c0, %c0_0] : memref<16x16xf32, #tpu.memory_space<vmem>>, vector<16x16xf32>
    %1 = arith.truncf %0 : vector<16x16xf32> to vector<16x16xbf16>
    %c0_1 = arith.constant 0 : index
    %c0_2 = arith.constant 0 : index
    %2 = vector.load %arg2[%c0_1, %c0_2] : memref<16x128xbf16, #tpu.memory_space<vmem>>, vector<16x128xbf16>
    %c0_3 = arith.constant 0 : index
    %c0_4 = arith.constant 0 : index
    %3 = vector.load %arg3[%c0_3, %c0_4] : memref<1x128xf32, #tpu.memory_space<vmem>>, vector<1x128xf32>
    %cst = arith.constant dense<0.000000e+00> : vector<16x128xf32>
    %4 = tpu.matmul %1, %2, %cst {dimension_numbers = #tpu.dot_dimension_numbers<[1], [0], [0], [1], [0, 0, 1, 1], [], []>} : vector<16x16xbf16>, vector<16x128xbf16>, vector<16x128xf32> -> vector<16x128xf32>
    %5 = vector.broadcast %3 : vector<1x128xf32> to vector<16x128xf32>
    %6 = arith.addf %4, %5 : vector<16x128xf32>
    %7 = math.tanh %6 : vector<16x128xf32>
    %8 = arith.truncf %7 : vector<16x128xf32> to vector<16x128xbf16>
    %c0_5 = arith.constant 0 : index
    %c0_6 = arith.constant 0 : index
    %9 = vector.load %arg4[%c0_5, %c0_6] : memref<128x128xbf16, #tpu.memory_space<vmem>>, vector<128x128xbf16>
    %c0_7 = arith.constant 0 : index
    %c0_8 = arith.constant 0 : index
    %10 = vector.load %arg5[%c0_7, %c0_8] : memref<1x128xf32, #tpu.memory_space<vmem>>, vector<1x128xf32>
    %cst_9 = arith.constant dense<0.000000e+00> : vector<16x128xf32>
    %11 = tpu.matmul %8, %9, %cst_9 {dimension_numbers = #tpu.dot_dimension_numbers<[1], [0], [0], [1], [0, 0, 1, 1], [], []>} : vector<16x128xbf16>, vector<128x128xbf16>, vector<16x128xf32> -> vector<16x128xf32>
    %12 = vector.broadcast %10 : vector<1x128xf32> to vector<16x128xf32>
    %13 = arith.addf %11, %12 : vector<16x128xf32>
    %14 = math.tanh %13 : vector<16x128xf32>
    %15 = arith.truncf %14 : vector<16x128xf32> to vector<16x128xbf16>
    %c0_10 = arith.constant 0 : index
    %c0_11 = arith.constant 0 : index
    %16 = vector.load %arg6[%c0_10, %c0_11] : memref<128x128xbf16, #tpu.memory_space<vmem>>, vector<128x128xbf16>
    %c0_12 = arith.constant 0 : index
    %c0_13 = arith.constant 0 : index
    %17 = vector.load %arg7[%c0_12, %c0_13] : memref<1x128xf32, #tpu.memory_space<vmem>>, vector<1x128xf32>
    %cst_14 = arith.constant dense<0.000000e+00> : vector<16x128xf32>
    %18 = tpu.matmul %15, %16, %cst_14 {dimension_numbers = #tpu.dot_dimension_numbers<[1], [0], [0], [1], [0, 0, 1, 1], [], []>} : vector<16x128xbf16>, vector<128x128xbf16>, vector<16x128xf32> -> vector<16x128xf32>
    %19 = vector.broadcast %17 : vector<1x128xf32> to vector<16x128xf32>
    %20 = arith.addf %18, %19 : vector<16x128xf32>
    %c0_15 = arith.constant 0 : index
    %c0_16 = arith.constant 0 : index
    %21 = vector.load %arg8[%c0_15, %c0_16] : memref<16x128xf32, #tpu.memory_space<vmem>>, vector<16x128xf32>
    tpu.vector_store %arg8[%c0_15, %c0_16], %20 {strides = array<i32>} : memref<16x128xf32, #tpu.memory_space<vmem>>, vector<16x128xf32>,
    return
  }
  func.func @transform_0(%arg0: i32) -> (i32, i32) {
    %c0_i32 = arith.constant 0 : i32
    %c0_i32_0 = arith.constant 0 : i32
    return %arg0, %c0_i32 : i32, i32
  }
  func.func @transform_1(%arg0: i32) -> (i32, i32) {
    %c0_i32 = arith.constant 0 : i32
    %c0_i32_0 = arith.constant 0 : i32
    %c0_i32_1 = arith.constant 0 : i32
    return %c0_i32, %c0_i32_0 : i32, i32
  }
  func.func @transform_2(%arg0: i32) -> (i32, i32) {
    %c0_i32 = arith.constant 0 : i32
    %c0_i32_0 = arith.constant 0 : i32
    %c0_i32_1 = arith.constant 0 : i32
    return %c0_i32, %c0_i32_0 : i32, i32
  }
  func.func @transform_3(%arg0: i32) -> (i32, i32) {
    %c0_i32 = arith.constant 0 : i32
    %c0_i32_0 = arith.constant 0 : i32
    %c0_i32_1 = arith.constant 0 : i32
    return %c0_i32, %c0_i32_0 : i32, i32
  }
  func.func @transform_4(%arg0: i32) -> (i32, i32) {
    %c0_i32 = arith.constant 0 : i32
    %c0_i32_0 = arith.constant 0 : i32
    %c0_i32_1 = arith.constant 0 : i32
    return %c0_i32, %c0_i32_0 : i32, i32
  }
  func.func @transform_5(%arg0: i32) -> (i32, i32) {
    %c0_i32 = arith.constant 0 : i32
    %c0_i32_0 = arith.constant 0 : i32
    %c0_i32_1 = arith.constant 0 : i32
    return %c0_i32, %c0_i32_0 : i32, i32
  }
  func.func @transform_6(%arg0: i32) -> (i32, i32) {
    %c0_i32 = arith.constant 0 : i32
    %c0_i32_0 = arith.constant 0 : i32
    %c0_i32_1 = arith.constant 0 : i32
    return %c0_i32, %c0_i32_0 : i32, i32
  }
  func.func @transform_7(%arg0: i32) -> (i32, i32) {
    %c0_i32 = arith.constant 0 : i32
    %c0_i32_0 = arith.constant 0 : i32
    return %arg0, %c0_i32 : i32, i32
  }
}

module attributes {stable_mosaic.version = 11 : i64} {
  func.func @_mlp_kernel(%arg0: i32, %arg1: memref<16x16xf32, #tpu.memory_space<vmem>>, %arg2: memref<16x128xbf16, #tpu.memory_space<vmem>>, %arg3: memref<1x128xf32, #tpu.memory_space<vmem>>, %arg4: memref<128x128xbf16, #tpu.memory_space<vmem>>, %arg5: memref<1x128xf32, #tpu.memory_space<vmem>>, %arg6: memref<128x128xbf16, #tpu.memory_space<vmem>>, %arg7: memref<1x128xf32, #tpu.memory_space<vmem>>, %arg8: memref<16x128xf32, #tpu.memory_space<vmem>>) attributes {dimension_semantics = [#tpu.dimension_semantics<parallel>], iteration_bounds = array<i64: 1>, scalar_prefetch = 0 : i64, scratch_operands = 0 : i64, tpu.core_type = #tpu.core_type<tc>, window_params = [{transform_indices = @transform_0, window_bounds = array<i64: 16, 16>}, {pipeline_mode = #tpu.pipeline_mode<synchronous>, transform_indices = @transform_1, window_bounds = array<i64: 16, 128>}, {pipeline_mode = #tpu.pipeline_mode<synchronous>, transform_indices = @transform_2, window_bounds = array<i64: 1, 128>}, {pipeline_mode = #tpu.pipeline_mode<synchronous>, transform_indices = @transform_3, window_bounds = array<i64: 128, 128>}, {pipeline_mode = #tpu.pipeline_mode<synchronous>, transform_indices = @transform_4, window_bounds = array<i64: 1, 128>}, {pipeline_mode = #tpu.pipeline_mode<synchronous>, transform_indices = @transform_5, window_bounds = array<i64: 128, 128>}, {pipeline_mode = #tpu.pipeline_mode<synchronous>, transform_indices = @transform_6, window_bounds = array<i64: 1, 128>}, {transform_indices = @transform_7, window_bounds = array<i64: 16, 128>}]} {
    %c0 = arith.constant 0 : index
    %c0_0 = arith.constant 0 : index
    %0 = vector.load %arg1[%c0, %c0_0] : memref<16x16xf32, #tpu.memory_space<vmem>>, vector<16x16xf32>
    %1 = arith.truncf %0 : vector<16x16xf32> to vector<16x16xbf16>
    %c0_1 = arith.constant 0 : index
    %c0_2 = arith.constant 0 : index
    %2 = vector.load %arg2[%c0_1, %c0_2] : memref<16x128xbf16, #tpu.memory_space<vmem>>, vector<16x128xbf16>
    %c0_3 = arith.constant 0 : index
    %c0_4 = arith.constant 0 : index
    %3 = vector.load %arg3[%c0_3, %c0_4] : memref<1x128xf32, #tpu.memory_space<vmem>>, vector<1x128xf32>
    %cst = arith.constant dense<0.000000e+00> : vector<16x128xf32>
    %4 = tpu.matmul %1, %2, %cst {dimension_numbers = #tpu.dot_dimension_numbers<[1], [0], [0], [1], [0, 0, 1, 1], [], []>} : vector<16x16xbf16>, vector<16x128xbf16>, vector<16x128xf32> -> vector<16x128xf32>
    %5 = vector.broadcast %3 : vector<1x128xf32> to vector<16x128xf32>
    %6 = arith.addf %4, %5 : vector<16x128xf32>
    %7 = math.tanh %6 : vector<16x128xf32>
    %8 = arith.truncf %7 : vector<16x128xf32> to vector<16x128xbf16>
    %c0_5 = arith.constant 0 : index
    %c0_6 = arith.constant 0 : index
    %9 = vector.load %arg4[%c0_5, %c0_6] : memref<128x128xbf16, #tpu.memory_space<vmem>>, vector<128x128xbf16>
    %c0_7 = arith.constant 0 : index
    %c0_8 = arith.constant 0 : index
    %10 = vector.load %arg5[%c0_7, %c0_8] : memref<1x128xf32, #tpu.memory_space<vmem>>, vector<1x128xf32>
    %cst_9 = arith.constant dense<0.000000e+00> : vector<16x128xf32>
    %11 = tpu.matmul %8, %9, %cst_9 {dimension_numbers = #tpu.dot_dimension_numbers<[1], [0], [0], [1], [0, 0, 1, 1], [], []>} : vector<16x128xbf16>, vector<128x128xbf16>, vector<16x128xf32> -> vector<16x128xf32>
    %12 = vector.broadcast %10 : vector<1x128xf32> to vector<16x128xf32>
    %13 = arith.addf %11, %12 : vector<16x128xf32>
    %14 = math.tanh %13 : vector<16x128xf32>
    %15 = arith.truncf %14 : vector<16x128xf32> to vector<16x128xbf16>
    %c0_10 = arith.constant 0 : index
    %c0_11 = arith.constant 0 : index
    %16 = vector.load %arg6[%c0_10, %c0_11] : memref<128x128xbf16, #tpu.memory_space<vmem>>, vector<128x128xbf16>
    %c0_12 = arith.constant 0 : index
    %c0_13 = arith.constant 0 : index
    %17 = vector.load %arg7[%c0_12, %c0_13] : memref<1x128xf32, #tpu.memory_space<vmem>>, vector<1x128xf32>
    %cst_14 = arith.constant dense<0.000000e+00> : vector<16x128xf32>
    %18 = tpu.matmul %15, %16, %cst_14 {dimension_numbers = #tpu.dot_dimension_numbers<[1], [0], [0], [1], [0, 0, 1, 1], [], []>} : vector<16x128xbf16>, vector<128x128xbf16>, vector<16x128xf32> -> vector<16x128xf32>
    %19 = vector.broadcast %17 : vector<1x128xf32> to vector<16x128xf32>
    %20 = arith.addf %18, %19 : vector<16x128xf32>
    %c0_15 = arith.constant 0 : index
    %c0_16 = arith.constant 0 : index
    %21 = vector.load %arg8[%c0_15, %c0_16] : memref<16x128xf32, #tpu.memory_space<vmem>>, vector<16x128xf32>
    tpu.vector_store %arg8[%c0_15, %c0_16], %20 {strides = array<i32>} : memref<16x128xf32, #tpu.memory_space<vmem>>, vector<16x128xf32>,
    return
  }
  func.func @transform_0(%arg0: i32) -> (i32, i32) {
    %c0_i32 = arith.constant 0 : i32
    %c0_i32_0 = arith.constant 0 : i32
    return %arg0, %c0_i32 : i32, i32
  }
  func.func @transform_1(%arg0: i32) -> (i32, i32) {
    %c0_i32 = arith.constant 0 : i32
    %c0_i32_0 = arith.constant 0 : i32
    %c0_i32_1 = arith.constant 0 : i32
    return %c0_i32, %c0_i32_0 : i32, i32
  }
  func.func @transform_2(%arg0: i32) -> (i32, i32) {
    %c0_i32 = arith.constant 0 : i32
    %c0_i32_0 = arith.constant 0 : i32
    %c0_i32_1 = arith.constant 0 : i32
    return %c0_i32, %c0_i32_0 : i32, i32
  }
  func.func @transform_3(%arg0: i32) -> (i32, i32) {
    %c0_i32 = arith.constant 0 : i32
    %c0_i32_0 = arith.constant 0 : i32
    %c0_i32_1 = arith.constant 0 : i32
    return %c0_i32, %c0_i32_0 : i32, i32
  }
  func.func @transform_4(%arg0: i32) -> (i32, i32) {
    %c0_i32 = arith.constant 0 : i32
    %c0_i32_0 = arith.constant 0 : i32
    %c0_i32_1 = arith.constant 0 : i32
    return %c0_i32, %c0_i32_0 : i32, i32
  }
  func.func @transform_5(%arg0: i32) -> (i32, i32) {
    %c0_i32 = arith.constant 0 : i32
    %c0_i32_0 = arith.constant 0 : i32
    %c0_i32_1 = arith.constant 0 : i32
    return %c0_i32, %c0_i32_0 : i32, i32
  }
  func.func @transform_6(%arg0: i32) -> (i32, i32) {
    %c0_i32 = arith.constant 0 : i32
    %c0_i32_0 = arith.constant 0 : i32
    %c0_i32_1 = arith.constant 0 : i32
    return %c0_i32, %c0_i32_0 : i32, i32
  }
  func.func @transform_7(%arg0: i32) -> (i32, i32) {
    %c0_i32 = arith.constant 0 : i32
    %c0_i32_0 = arith.constant 0 : i32
    return %arg0, %c0_i32 : i32, i32
  }
}

</mosaic_0001>

<bundles_post_ra>
// kernel: tpu_custom_call.1
= control target key start
LH: loop header
LB: loop body
LE: loop exit
PB: predicated region body
PF: predicated region fallthrough
CT: control target
= control target key end

     0   :  { %12 = vsyncpa [#allocation3], 0  ;;  %s803_s0 = inlined_call_operand.hbm [shape: f32[16,16], index: 0, kind: input, shape index: {}]   ;;  %s804_s1 = inlined_call_operand.hbm [shape: bf16[16,128], index: 1, kind: input, shape index: {}]   ;;  %s805_s2 = inlined_call_operand.vmem [shape: f32[1,128], index: 2, kind: input, shape index: {}]   ;;  %s806_s3 = inlined_call_operand.hbm [shape: bf16[128,128], index: 3, kind: input, shape index: {}]   ;;  %s807_s4 = inlined_call_operand.vmem [shape: f32[1,128], index: 4, kind: input, shape index: {}]   ;;  %s808_s5 = inlined_call_operand.hbm [shape: bf16[128,128], index: 5, kind: input, shape index: {}]   ;;  %s809_s6 = inlined_call_operand.vmem [shape: f32[1,128], index: 6, kind: input, shape index: {}]   ;;  %s810_s7 = inlined_call_operand.hbm [shape: f32[16,128], index: 7, kind: output, shape index: {}]  }
   0x1   :  { %13 = vsyncpa [#allocation6], 0 }
   0x2   :  { %14 = vsyncpa [#allocation9], 0 }
   0x3   :  { %15 = vsyncpa [#allocation4], 0  ;;  %s638_s24 = smov [#allocation5]   ;;  %s520_s28 = scalar_lea.hbm %s804_s1, 128 }
   0x4   :  { %s33_s25 = sshll.u32 %s638_s24, 4  ;;  %p521_p0 = scmp.ne.s32.totalorder %s804_s1, %s520_s28  ;;  %s34_s25 = int_to_ptr.vmem [resolvable:$true] %s33_s25 }
   0x5   :  { %p524_p1 = scmp.lt.u32.totalorder %s520_s28, %s804_s1 }
   0x7   :  { %p526_p2 = pnand %p524_p1, %p521_p0 }
   0x9   :  { %529 = shalt.err (!%p526_p2)
}
   0xa   :  { %s530_s10 = scalar_lea.vmem %s34_s25, 128  ;;  %p535_p4 = scmp.lt.s32.totalorder %s34_s25, %s34_s25 }
   0xb   :  { %p531_p3 = scmp.ne.s32.totalorder %s34_s25, %s530_s10  ;;  %p536_p5 = scmp.lt.s32.totalorder %s530_s10, %s530_s10 }
   0xd   :  { %p537_p6 = por %p536_p5, %p535_p4 }
   0xf   :  { %p538_p7 = pnand %p537_p6, %p531_p3 }
  0x11   :  { %541 = shalt.err (!%p538_p7)
}
  0x12   :  { %s639_s11 = smov 64   ;;  %s640_s12 = smov 4  }
  0x13   :  { %39 = dma.hbm_to_vmem [thread:$0]  %s804_s1, 128, %s34_s25, [#allocation6], %s639_s11, %s639_s11, %s640_s12  }
  0x14   :  { %s641_s15 = smov [#allocation2]   ;;  %s542_s19 = scalar_lea.hbm %s803_s0, 256 }
  0x15   :  { %s21_s16 = sshll.u32 %s641_s15, 4  ;;  %p543_p8 = scmp.ne.s32.totalorder %s803_s0, %s542_s19  ;;  %s22_s16 = int_to_ptr.vmem [resolvable:$true] %s21_s16 }
  0x16   :  { %p546_p9 = scmp.lt.u32.totalorder %s542_s19, %s803_s0 }
  0x18   :  { %p548_p10 = pnand %p546_p9, %p543_p8 }
  0x1a   :  { %551 = shalt.err (!%p548_p10)
}
  0x1b   :  { %s552_s24 = scalar_lea.vmem %s22_s16, 256  ;;  %p557_p12 = scmp.lt.s32.totalorder %s22_s16, %s22_s16 }
  0x1c   :  { %p553_p11 = scmp.ne.s32.totalorder %s22_s16, %s552_s24  ;;  %p558_p13 = scmp.lt.s32.totalorder %s552_s24, %s552_s24 }
  0x1e   :  { %p559_p0 = por %p558_p13, %p557_p12 }
  0x20   :  { %p560_p1 = pnand %p559_p0, %p553_p11 }
  0x22   :  { %563 = shalt.err (!%p560_p1)
}
  0x23   :  { %s642_s1 = smov 128   ;;  %s643_s25 = smov 8  }
  0x24   :  { %27 = dma.hbm_to_vmem [thread:$0]  %s803_s0, 256, %s22_s16, [#allocation3], %s642_s1, %s642_s1, %s643_s25  }
  0x25   :  { %s644_s28 = smov [#allocation7]   ;;  %s645_s30 = smov [#allocation8]  }
  0x26   :  { %s47_s29 = sshll.u32 %s644_s28, 4  ;;  %s61_s8 = sshll.u32 %s645_s30, 4  ;;  %s48_s29 = int_to_ptr.vmem [resolvable:$true] %s47_s29  ;;  %s719_s8 = int_to_ptr.vmem [resolvable:$true] %s61_s8 }
  0x27   :  { %s564_s13 = scalar_lea.hbm %s806_s3, 1024 }
  0x28   :  { %p565_p2 = scmp.ne.s32.totalorder %s806_s3, %s564_s13  ;;  %p568_p3 = scmp.lt.u32.totalorder %s564_s13, %s806_s3 }
  0x2a   :  { %p570_p4 = pnand %p568_p3, %p565_p2 }
  0x2c   :  { %573 = shalt.err (!%p570_p4)
}
  0x2d   :  { %s574_s0 = scalar_lea.vmem %s48_s29, 1024  ;;  %p579_p6 = scmp.lt.s32.totalorder %s48_s29, %s48_s29 }
  0x2e   :  { %p575_p5 = scmp.ne.s32.totalorder %s48_s29, %s574_s0  ;;  %p580_p7 = scmp.lt.s32.totalorder %s574_s0, %s574_s0 }
  0x30   :  { %p581_p8 = por %p580_p7, %p579_p6 }
  0x32   :  { %p582_p9 = pnand %p581_p8, %p575_p5 }
  0x34   :  { %585 = shalt.err (!%p582_p9)
}
  0x35   :  { %53 = dma.hbm_to_vmem [thread:$0]  %s806_s3, 1024, %s48_s29, [#allocation6], %s639_s11, %s639_s11, %s640_s12  }
  0x36   :  { %s586_s22 = scalar_lea.hbm %s808_s5, 1024 }
  0x37   :  { %p587_p10 = scmp.ne.s32.totalorder %s808_s5, %s586_s22  ;;  %p590_p11 = scmp.lt.u32.totalorder %s586_s22, %s808_s5 }
  0x39   :  { %p592_p12 = pnand %p590_p11, %p587_p10 }
  0x3b   :  { %595 = shalt.err (!%p592_p12)
}
  0x3c   :  { %s596_s28 = scalar_lea.vmem %s719_s8, 1024  ;;  %p601_p0 = scmp.lt.s32.totalorder %s719_s8, %s719_s8 }
  0x3d   :  { %p597_p13 = scmp.ne.s32.totalorder %s719_s8, %s596_s28  ;;  %p602_p1 = scmp.lt.s32.totalorder %s596_s28, %s596_s28 }
  0x3f   :  { %p603_p2 = por %p602_p1, %p601_p0 }
  0x41   :  { %p604_p3 = pnand %p603_p2, %p597_p13 }
  0x43   :  { %607 = shalt.err (!%p604_p3)
}
  0x44   :  { %67 = dma.hbm_to_vmem [thread:$0]  %s808_s5, 1024, %s719_s8, [#allocation9], %s639_s11, %s639_s11, %s640_s12  }
  0x45   :  { %630 = dma.done.wait [#allocation3], 256  }
  0x46   :  { %631 = vsyncadd [#allocation3], 4294967040 }
  0x47   :  { %632 = dma.done.wait [#allocation6], 1152  }
  0x48   :  { %633 = vsyncadd [#allocation6], 4294966144 }
  0x49   :  { %634 = dma.done.wait [#allocation9], 1024  }
  0x4a   :  { %635 = vsyncadd [#allocation9], 4294966272  ;;  %v646_v0 = vmov 0.0   ;;  %vm647_vm0 = vmmov 0   ;;  %v495_v1 = vld [vmem:[#allocation5] sm:$0xff]   ;;  %v83_v2 = vld [vmem:[#allocation2] sm:$0xff] }
  0x4b   :  { %438 = vmatprep.subr.bf16.mxu0 %v646_v0  ;;  %440 = vmatprep.mubr.msk.bf16.mxu0 %vm647_vm0, %v646_v0  ;;  %v84_v3 = vld [vmem:[#allocation2 + $0x8] sm:$0xff]  ;;  %vm101_vm1 = vcmask 130048   ;;  %v496_v5 = vld [vmem:[#allocation7] sm:$0xff]   ;;  %v497_v6 = vld [vmem:[#allocation7 + $0x8] sm:$0xff]   ;;  %s648_s9 = smov [#allocation10]  }
  0x4c   :  { %444 = vmatprep.subr.bf16.mxu1 %v646_v0  ;;  %460 = vmatprep.mubr.msk.bf16.mxu1 %vm647_vm0, %v646_v0  ;;  %v85_v4 = vpack.c.bf16 %v84_v3, %v83_v2  ;;  %v498_v7 = vld [vmem:[#allocation7 + $0x10] sm:$0xff]   ;;  %v499_v8 = vld [vmem:[#allocation7 + $0x18] sm:$0xff]   ;;  %v500_v9 = vld [vmem:[#allocation7 + $0x20] sm:$0xff]   ;;  %s383_s10 = sshll.u32 %s648_s9, 4  ;;  %s384_s10 = int_to_ptr.vmem [resolvable:$true] %s383_s10 }
  0x4d   :  { %439 = vmatpush3.bf16.msra.mxu0 %v495_v1  ;;  %445 = vmatpush3.bf16.msra.mxu1 %v496_v5  ;;  %v501_v10 = vld [vmem:[#allocation7 + $0x28] sm:$0xff]   ;;  %v502_v11 = vld [vmem:[#allocation7 + $0x30] sm:$0xff]   ;;  %v503_v12 = vld [vmem:[#allocation7 + $0x38] sm:$0xff]   ;;  %p613_p5 = scmp.lt.s32.totalorder %s384_s10, %s384_s10 }
  0x4e   :  { %464 = vmatprep.subr.bf16.mxu0 %v646_v0  ;;  %446 = vmatprep.subr.bf16.mxu1 %v646_v0  ;;  %v504_v13 = vld [vmem:[#allocation8] sm:$0xff]   ;;  %v505_v14 = vld [vmem:[#allocation8 + $0x8] sm:$0xff]   ;;  %v506_v15 = vld [vmem:[#allocation8 + $0x10] sm:$0xff]  }
  0x4f   :  { %v507_v16 = vld [vmem:[#allocation8 + $0x18] sm:$0xff]   ;;  %v397_v17 = vld [vmem:[%s805_s2] ss:$0 sm:$0xff]  ;;  %v508_v27 = vld [vmem:[#allocation8 + $0x20] sm:$0xff]  }
  0x50   :  { %441 = vmatmul.mubr.msk.bf16.vlgmr.msra.gmra.mrb[0].mxu0 %vm101_vm1, %v85_v4  ;;  %v509_v28 = vld [vmem:[#allocation8 + $0x28] sm:$0xff]   ;;  %v510_v29 = vld [vmem:[#allocation8 + $0x30] sm:$0xff]   ;;  %v511_v30 = vld [vmem:[#allocation8 + $0x38] sm:$0xff]  }
  0x51   :  { %480 = vmatprep.mubr.msk.bf16.mxu0 %vm647_vm0, %v646_v0  ;;  %447 = vmatpush3.bf16.msra.mxu1 %v497_v6  ;;  %v400_v31 = vld [vmem:[%s807_s4] ss:$0 sm:$0xff]  ;;  %s608_s4 = scalar_lea.vmem %s384_s10, 256 }
  0x52   :  { %448 = vmatprep.subr.bf16.mxu1 %v646_v0  ;;  %465 = vmatpush3.bf16.msra.mxu0 %v504_v13  ;;  %v409_v41 = vld [vmem:[%s809_s6] ss:$0 sm:$0xff]  ;;  %p609_p4 = scmp.ne.s32.totalorder %s384_s10, %s608_s4  ;;  %p614_p6 = scmp.lt.s32.totalorder %s608_s4, %s608_s4 }
  0x53   :  { %466 = vmatprep.subr.bf16.mxu0 %v646_v0 }
  0x54   :  { %p615_p7 = por %p614_p6, %p613_p5 }
  0x55   :  { %449 = vmatpush3.bf16.msra.mxu1 %v498_v7 }
  0x56   :  { %450 = vmatprep.subr.bf16.mxu1 %v646_v0  ;;  %467 = vmatpush3.bf16.msra.mxu0 %v505_v14  ;;  %p616_p8 = pnand %p615_p7, %p609_p4 }
  0x57   :  { %468 = vmatprep.subr.bf16.mxu0 %v646_v0 }
  0x59   :  { %451 = vmatpush3.bf16.msra.mxu1 %v499_v8 }
  0x5a   :  { %452 = vmatprep.subr.bf16.mxu1 %v646_v0  ;;  %469 = vmatpush3.bf16.msra.mxu0 %v506_v15 }
  0x5b   :  { %470 = vmatprep.subr.bf16.mxu0 %v646_v0 }
  0x5d   :  { %453 = vmatpush3.bf16.msra.mxu1 %v500_v9 }
  0x5e   :  { %454 = vmatprep.subr.bf16.mxu1 %v646_v0  ;;  %471 = vmatpush3.bf16.msra.mxu0 %v507_v16 }
  0x5f   :  { %472 = vmatprep.subr.bf16.mxu0 %v646_v0 }
  0x61   :  { %455 = vmatpush3.bf16.msra.mxu1 %v501_v10 }
  0x62   :  { %456 = vmatprep.subr.bf16.mxu1 %v646_v0  ;;  %473 = vmatpush3.bf16.msra.mxu0 %v508_v27 }
  0x63   :  { %474 = vmatprep.subr.bf16.mxu0 %v646_v0 }
  0x65   :  { %457 = vmatpush3.bf16.msra.mxu1 %v502_v11 }
  0x66   :  { %458 = vmatprep.subr.bf16.mxu1 %v646_v0  ;;  %475 = vmatpush3.bf16.msra.mxu0 %v509_v28 }
  0x67   :  { %476 = vmatprep.subr.bf16.mxu0 %v646_v0 }
  0x69   :  { %459 = vmatpush3.bf16.msra.mxu1 %v503_v12 }
  0x6a   :  { %477 = vmatpush3.bf16.msra.mxu0 %v510_v29 }
  0x6b   :  { %478 = vmatprep.subr.bf16.mxu0 %v646_v0 }
  0x6e   :  { %479 = vmatpush3.bf16.msra.mxu0 %v511_v30 }
 0x123   :  { %v139_v18 = vpop.f32.mrb[0].mxu0 }
 0x124   :  { %v140_v19 = vadd.f32 %v397_v17, %v139_v18  ;;  %v442_v20 = vpop.f32.mrb[1].mxu0 }
 0x125   :  { %v142_v21 = vpop.f32.mrb[2].mxu0 }
 0x126   :  { %v143_v22 = vadd.f32 %v397_v17, %v142_v21  ;;  %v443_v23 = vpop.f32.mrb[3].mxu0  ;;  %512 = vtanh.f32 %v140_v19 }
 0x128   :  { %514 = vtanh.f32 %v143_v22 }
 0x130   :  { %v513_v24 = vpop.eup %512 }
 0x132   :  { %v515_v25 = vpop.eup %514 }
 0x133   :  { %v148_v26 = vpack.c.bf16 %v515_v25, %v513_v24 }
 0x135   :  { %461 = vmatmul.mubr.bf16.vlgmr.msra.gmra.mrb[0].mxu1 %v148_v26 }
 0x208   :  { %v254_v32 = vpop.f32.mrb[0].mxu1 }
 0x209   :  { %v255_v33 = vadd.f32 %v400_v31, %v254_v32  ;;  %v462_v34 = vpop.f32.mrb[1].mxu1 }
 0x20a   :  { %v257_v35 = vpop.f32.mrb[2].mxu1 }
 0x20b   :  { %v258_v36 = vadd.f32 %v400_v31, %v257_v35  ;;  %v463_v37 = vpop.f32.mrb[3].mxu1  ;;  %516 = vtanh.f32 %v255_v33 }
 0x20d   :  { %518 = vtanh.f32 %v258_v36 }
 0x215   :  { %v517_v38 = vpop.eup %516 }
 0x217   :  { %v519_v39 = vpop.eup %518 }
 0x218   :  { %v263_v40 = vpack.c.bf16 %v519_v39, %v517_v38 }
 0x21a   :  { %481 = vmatmul.mubr.bf16.vlgmr.msra.gmra.mrb[4].mxu0 %v263_v40 }
 0x2ed   :  { %v369_v42 = vpop.f32.mrb[4].mxu0 }
 0x2ee   :  { %v370_v43 = vadd.f32 %v409_v41, %v369_v42  ;;  %v482_v44 = vpop.f32.mrb[5].mxu0 }
 0x2ef   :  { %v372_v45 = vpop.f32.mrb[6].mxu0 }
 0x2f0   :  { %376 = vst [vmem:[#allocation10] sm:$0xff] %v370_v43  ;;  %v373_v46 = vadd.f32 %v409_v41, %v372_v45  ;;  %v483_v47 = vpop.f32.mrb[7].mxu0 }
 0x2f2   :  { %377 = vst [vmem:[#allocation10 + $0x8] sm:$0xff] %v373_v46 }
 0x2f3   :  { %619 = shalt.err (!%p616_p8)
}
 0x2f4   :  { %s620_s14 = scalar_lea.hbm %s810_s7, 256 }
 0x2f5   :  { %p621_p9 = scmp.ne.s32.totalorder %s810_s7, %s620_s14  ;;  %p624_p10 = scmp.lt.u32.totalorder %s620_s14, %s810_s7 }
 0x2f7   :  { %p626_p11 = pnand %p624_p10, %p621_p9 }
 0x2f9   :  { %629 = shalt.err (!%p626_p11)
}
 0x2fa   :  { %389 = dma.vmem_to_hbm [thread:$0]  %s384_s10, 256, %s810_s7, [#allocation4], %s642_s1, %s642_s1, %s643_s25  }
 0x2fb   :  { %636 = dma.done.wait [#allocation4], 256  }
 0x2fc   :  { %637 = vsyncadd [#allocation4], 4294967040 }
 0x2fd   :  { %393 = vsyncpa [#allocation3], 1 }
 0x2fe   :  { %394 = vsyncpa [#allocation6], 1 }
 0x2ff   :  { %395 = vsyncpa [#allocation9], 1 }
 0x300   :  { %396 = vsyncpa [#allocation4], 1 }

// kernel: tpu_custom_call.1
= control target key start
LH: loop header
LB: loop body
LE: loop exit
PB: predicated region body
PF: predicated region fallthrough
CT: control target
= control target key end

     0   :  { %12 = vsyncpa [#allocation3], 0  ;;  %s803_s0 = inlined_call_operand.hbm [shape: f32[16,16], index: 0, kind: input, shape index: {}]   ;;  %s804_s1 = inlined_call_operand.hbm [shape: bf16[16,128], index: 1, kind: input, shape index: {}]   ;;  %s805_s2 = inlined_call_operand.vmem [shape: f32[1,128], index: 2, kind: input, shape index: {}]   ;;  %s806_s3 = inlined_call_operand.hbm [shape: bf16[128,128], index: 3, kind: input, shape index: {}]   ;;  %s807_s4 = inlined_call_operand.vmem [shape: f32[1,128], index: 4, kind: input, shape index: {}]   ;;  %s808_s5 = inlined_call_operand.hbm [shape: bf16[128,128], index: 5, kind: input, shape index: {}]   ;;  %s809_s6 = inlined_call_operand.vmem [shape: f32[1,128], index: 6, kind: input, shape index: {}]   ;;  %s810_s7 = inlined_call_operand.hbm [shape: f32[16,128], index: 7, kind: output, shape index: {}]  }
   0x1   :  { %13 = vsyncpa [#allocation6], 0 }
   0x2   :  { %14 = vsyncpa [#allocation9], 0 }
   0x3   :  { %15 = vsyncpa [#allocation4], 0  ;;  %s638_s24 = smov [#allocation5]   ;;  %s520_s28 = scalar_lea.hbm %s804_s1, 128 }
   0x4   :  { %s33_s25 = sshll.u32 %s638_s24, 4  ;;  %p521_p0 = scmp.ne.s32.totalorder %s804_s1, %s520_s28  ;;  %s34_s25 = int_to_ptr.vmem [resolvable:$true] %s33_s25 }
   0x5   :  { %p524_p1 = scmp.lt.u32.totalorder %s520_s28, %s804_s1 }
   0x7   :  { %p526_p2 = pnand %p524_p1, %p521_p0 }
   0x9   :  { %529 = shalt.err (!%p526_p2)
}
   0xa   :  { %s530_s10 = scalar_lea.vmem %s34_s25, 128  ;;  %p535_p4 = scmp.lt.s32.totalorder %s34_s25, %s34_s25 }
   0xb   :  { %p531_p3 = scmp.ne.s32.totalorder %s34_s25, %s530_s10  ;;  %p536_p5 = scmp.lt.s32.totalorder %s530_s10, %s530_s10 }
   0xd   :  { %p537_p6 = por %p536_p5, %p535_p4 }
   0xf   :  { %p538_p7 = pnand %p537_p6, %p531_p3 }
  0x11   :  { %541 = shalt.err (!%p538_p7)
}
  0x12   :  { %s639_s11 = smov 64   ;;  %s640_s12 = smov 4  }
  0x13   :  { %39 = dma.hbm_to_vmem [thread:$0]  %s804_s1, 128, %s34_s25, [#allocation6], %s639_s11, %s639_s11, %s640_s12  }
  0x14   :  { %s641_s15 = smov [#allocation2]   ;;  %s542_s19 = scalar_lea.hbm %s803_s0, 256 }
  0x15   :  { %s21_s16 = sshll.u32 %s641_s15, 4  ;;  %p543_p8 = scmp.ne.s32.totalorder %s803_s0, %s542_s19  ;;  %s22_s16 = int_to_ptr.vmem [resolvable:$true] %s21_s16 }
  0x16   :  { %p546_p9 = scmp.lt.u32.totalorder %s542_s19, %s803_s0 }
  0x18   :  { %p548_p10 = pnand %p546_p9, %p543_p8 }
  0x1a   :  { %551 = shalt.err (!%p548_p10)
}
  0x1b   :  { %s552_s24 = scalar_lea.vmem %s22_s16, 256  ;;  %p557_p12 = scmp.lt.s32.totalorder %s22_s16, %s22_s16 }
  0x1c   :  { %p553_p11 = scmp.ne.s32.totalorder %s22_s16, %s552_s24  ;;  %p558_p13 = scmp.lt.s32.totalorder %s552_s24, %s552_s24 }
  0x1e   :  { %p559_p0 = por %p558_p13, %p557_p12 }
  0x20   :  { %p560_p1 = pnand %p559_p0, %p553_p11 }
  0x22   :  { %563 = shalt.err (!%p560_p1)
}
  0x23   :  { %s642_s1 = smov 128   ;;  %s643_s25 = smov 8  }
  0x24   :  { %27 = dma.hbm_to_vmem [thread:$0]  %s803_s0, 256, %s22_s16, [#allocation3], %s642_s1, %s642_s1, %s643_s25  }
  0x25   :  { %s644_s28 = smov [#allocation7]   ;;  %s645_s30 = smov [#allocation8]  }
  0x26   :  { %s47_s29 = sshll.u32 %s644_s28, 4  ;;  %s61_s8 = sshll.u32 %s645_s30, 4  ;;  %s48_s29 = int_to_ptr.vmem [resolvable:$true] %s47_s29  ;;  %s719_s8 = int_to_ptr.vmem [resolvable:$true] %s61_s8 }
  0x27   :  { %s564_s13 = scalar_lea.hbm %s806_s3, 1024 }
  0x28   :  { %p565_p2 = scmp.ne.s32.totalorder %s806_s3, %s564_s13  ;;  %p568_p3 = scmp.lt.u32.totalorder %s564_s13, %s806_s3 }
  0x2a   :  { %p570_p4 = pnand %p568_p3, %p565_p2 }
  0x2c   :  { %573 = shalt.err (!%p570_p4)
}
  0x2d   :  { %s574_s0 = scalar_lea.vmem %s48_s29, 1024  ;;  %p579_p6 = scmp.lt.s32.totalorder %s48_s29, %s48_s29 }
  0x2e   :  { %p575_p5 = scmp.ne.s32.totalorder %s48_s29, %s574_s0  ;;  %p580_p7 = scmp.lt.s32.totalorder %s574_s0, %s574_s0 }
  0x30   :  { %p581_p8 = por %p580_p7, %p579_p6 }
  0x32   :  { %p582_p9 = pnand %p581_p8, %p575_p5 }
  0x34   :  { %585 = shalt.err (!%p582_p9)
}
  0x35   :  { %53 = dma.hbm_to_vmem [thread:$0]  %s806_s3, 1024, %s48_s29, [#allocation6], %s639_s11, %s639_s11, %s640_s12  }
  0x36   :  { %s586_s22 = scalar_lea.hbm %s808_s5, 1024 }
  0x37   :  { %p587_p10 = scmp.ne.s32.totalorder %s808_s5, %s586_s22  ;;  %p590_p11 = scmp.lt.u32.totalorder %s586_s22, %s808_s5 }
  0x39   :  { %p592_p12 = pnand %p590_p11, %p587_p10 }
  0x3b   :  { %595 = shalt.err (!%p592_p12)
}
  0x3c   :  { %s596_s28 = scalar_lea.vmem %s719_s8, 1024  ;;  %p601_p0 = scmp.lt.s32.totalorder %s719_s8, %s719_s8 }
  0x3d   :  { %p597_p13 = scmp.ne.s32.totalorder %s719_s8, %s596_s28  ;;  %p602_p1 = scmp.lt.s32.totalorder %s596_s28, %s596_s28 }
  0x3f   :  { %p603_p2 = por %p602_p1, %p601_p0 }
  0x41   :  { %p604_p3 = pnand %p603_p2, %p597_p13 }
  0x43   :  { %607 = shalt.err (!%p604_p3)
}
  0x44   :  { %67 = dma.hbm_to_vmem [thread:$0]  %s808_s5, 1024, %s719_s8, [#allocation9], %s639_s11, %s639_s11, %s640_s12  }
  0x45   :  { %630 = dma.done.wait [#allocation3], 256  }
  0x46   :  { %631 = vsyncadd [#allocation3], 4294967040 }
  0x47   :  { %632 = dma.done.wait [#allocation6], 1152  }
  0x48   :  { %633 = vsyncadd [#allocation6], 4294966144 }
  0x49   :  { %634 = dma.done.wait [#allocation9], 1024  }
  0x4a   :  { %635 = vsyncadd [#allocation9], 4294966272  ;;  %v646_v0 = vmov 0.0   ;;  %vm647_vm0 = vmmov 0   ;;  %v495_v1 = vld [vmem:[#allocation5] sm:$0xff]   ;;  %v83_v2 = vld [vmem:[#allocation2] sm:$0xff] }
  0x4b   :  { %438 = vmatprep.subr.bf16.mxu0 %v646_v0  ;;  %440 = vmatprep.mubr.msk.bf16.mxu0 %vm647_vm0, %v646_v0  ;;  %v84_v3 = vld [vmem:[#allocation2 + $0x8] sm:$0xff]  ;;  %vm101_vm1 = vcmask 130048   ;;  %v496_v5 = vld [vmem:[#allocation7] sm:$0xff]   ;;  %v497_v6 = vld [vmem:[#allocation7 + $0x8] sm:$0xff]   ;;  %s648_s9 = smov [#allocation10]  }
  0x4c   :  { %444 = vmatprep.subr.bf16.mxu1 %v646_v0  ;;  %460 = vmatprep.mubr.msk.bf16.mxu1 %vm647_vm0, %v646_v0  ;;  %v85_v4 = vpack.c.bf16 %v84_v3, %v83_v2  ;;  %v498_v7 = vld [vmem:[#allocation7 + $0x10] sm:$0xff]   ;;  %v499_v8 = vld [vmem:[#allocation7 + $0x18] sm:$0xff]   ;;  %v500_v9 = vld [vmem:[#allocation7 + $0x20] sm:$0xff]   ;;  %s383_s10 = sshll.u32 %s648_s9, 4  ;;  %s384_s10 = int_to_ptr.vmem [resolvable:$true] %s383_s10 }
  0x4d   :  { %439 = vmatpush3.bf16.msra.mxu0 %v495_v1  ;;  %445 = vmatpush3.bf16.msra.mxu1 %v496_v5  ;;  %v501_v10 = vld [vmem:[#allocation7 + $0x28] sm:$0xff]   ;;  %v502_v11 = vld [vmem:[#allocation7 + $0x30] sm:$0xff]   ;;  %v503_v12 = vld [vmem:[#allocation7 + $0x38] sm:$0xff]   ;;  %p613_p5 = scmp.lt.s32.totalorder %s384_s10, %s384_s10 }
  0x4e   :  { %464 = vmatprep.subr.bf16.mxu0 %v646_v0  ;;  %446 = vmatprep.subr.bf16.mxu1 %v646_v0  ;;  %v504_v13 = vld [vmem:[#allocation8] sm:$0xff]   ;;  %v505_v14 = vld [vmem:[#allocation8 + $0x8] sm:$0xff]   ;;  %v506_v15 = vld [vmem:[#allocation8 + $0x10] sm:$0xff]  }
  0x4f   :  { %v507_v16 = vld [vmem:[#allocation8 + $0x18] sm:$0xff]   ;;  %v397_v17 = vld [vmem:[%s805_s2] ss:$0 sm:$0xff]  ;;  %v508_v27 = vld [vmem:[#allocation8 + $0x20] sm:$0xff]  }
  0x50   :  { %441 = vmatmul.mubr.msk.bf16.vlgmr.msra.gmra.mrb[0].mxu0 %vm101_vm1, %v85_v4  ;;  %v509_v28 = vld [vmem:[#allocation8 + $0x28] sm:$0xff]   ;;  %v510_v29 = vld [vmem:[#allocation8 + $0x30] sm:$0xff]   ;;  %v511_v30 = vld [vmem:[#allocation8 + $0x38] sm:$0xff]  }
  0x51   :  { %480 = vmatprep.mubr.msk.bf16.mxu0 %vm647_vm0, %v646_v0  ;;  %447 = vmatpush3.bf16.msra.mxu1 %v497_v6  ;;  %v400_v31 = vld [vmem:[%s807_s4] ss:$0 sm:$0xff]  ;;  %s608_s4 = scalar_lea.vmem %s384_s10, 256 }
  0x52   :  { %448 = vmatprep.subr.bf16.mxu1 %v646_v0  ;;  %465 = vmatpush3.bf16.msra.mxu0 %v504_v13  ;;  %v409_v41 = vld [vmem:[%s809_s6] ss:$0 sm:$0xff]  ;;  %p609_p4 = scmp.ne.s32.totalorder %s384_s10, %s608_s4  ;;  %p614_p6 = scmp.lt.s32.totalorder %s608_s4, %s608_s4 }
  0x53   :  { %466 = vmatprep.subr.bf16.mxu0 %v646_v0 }
  0x54   :  { %p615_p7 = por %p614_p6, %p613_p5 }
  0x55   :  { %449 = vmatpush3.bf16.msra.mxu1 %v498_v7 }
  0x56   :  { %450 = vmatprep.subr.bf16.mxu1 %v646_v0  ;;  %467 = vmatpush3.bf16.msra.mxu0 %v505_v14  ;;  %p616_p8 = pnand %p615_p7, %p609_p4 }
  0x57   :  { %468 = vmatprep.subr.bf16.mxu0 %v646_v0 }
  0x59   :  { %451 = vmatpush3.bf16.msra.mxu1 %v499_v8 }
  0x5a   :  { %452 = vmatprep.subr.bf16.mxu1 %v646_v0  ;;  %469 = vmatpush3.bf16.msra.mxu0 %v506_v15 }
  0x5b   :  { %470 = vmatprep.subr.bf16.mxu0 %v646_v0 }
  0x5d   :  { %453 = vmatpush3.bf16.msra.mxu1 %v500_v9 }
  0x5e   :  { %454 = vmatprep.subr.bf16.mxu1 %v646_v0  ;;  %471 = vmatpush3.bf16.msra.mxu0 %v507_v16 }
  0x5f   :  { %472 = vmatprep.subr.bf16.mxu0 %v646_v0 }
  0x61   :  { %455 = vmatpush3.bf16.msra.mxu1 %v501_v10 }
  0x62   :  { %456 = vmatprep.subr.bf16.mxu1 %v646_v0  ;;  %473 = vmatpush3.bf16.msra.mxu0 %v508_v27 }
  0x63   :  { %474 = vmatprep.subr.bf16.mxu0 %v646_v0 }
  0x65   :  { %457 = vmatpush3.bf16.msra.mxu1 %v502_v11 }
  0x66   :  { %458 = vmatprep.subr.bf16.mxu1 %v646_v0  ;;  %475 = vmatpush3.bf16.msra.mxu0 %v509_v28 }
  0x67   :  { %476 = vmatprep.subr.bf16.mxu0 %v646_v0 }
  0x69   :  { %459 = vmatpush3.bf16.msra.mxu1 %v503_v12 }
  0x6a   :  { %477 = vmatpush3.bf16.msra.mxu0 %v510_v29 }
  0x6b   :  { %478 = vmatprep.subr.bf16.mxu0 %v646_v0 }
  0x6e   :  { %479 = vmatpush3.bf16.msra.mxu0 %v511_v30 }
 0x123   :  { %v139_v18 = vpop.f32.mrb[0].mxu0 }
 0x124   :  { %v140_v19 = vadd.f32 %v397_v17, %v139_v18  ;;  %v442_v20 = vpop.f32.mrb[1].mxu0 }
 0x125   :  { %v142_v21 = vpop.f32.mrb[2].mxu0 }
 0x126   :  { %v143_v22 = vadd.f32 %v397_v17, %v142_v21  ;;  %v443_v23 = vpop.f32.mrb[3].mxu0  ;;  %512 = vtanh.f32 %v140_v19 }
 0x128   :  { %514 = vtanh.f32 %v143_v22 }
 0x130   :  { %v513_v24 = vpop.eup %512 }
 0x132   :  { %v515_v25 = vpop.eup %514 }
 0x133   :  { %v148_v26 = vpack.c.bf16 %v515_v25, %v513_v24 }
 0x135   :  { %461 = vmatmul.mubr.bf16.vlgmr.msra.gmra.mrb[0].mxu1 %v148_v26 }
 0x208   :  { %v254_v32 = vpop.f32.mrb[0].mxu1 }
 0x209   :  { %v255_v33 = vadd.f32 %v400_v31, %v254_v32  ;;  %v462_v34 = vpop.f32.mrb[1].mxu1 }
 0x20a   :  { %v257_v35 = vpop.f32.mrb[2].mxu1 }
 0x20b   :  { %v258_v36 = vadd.f32 %v400_v31, %v257_v35  ;;  %v463_v37 = vpop.f32.mrb[3].mxu1  ;;  %516 = vtanh.f32 %v255_v33 }
 0x20d   :  { %518 = vtanh.f32 %v258_v36 }
 0x215   :  { %v517_v38 = vpop.eup %516 }
 0x217   :  { %v519_v39 = vpop.eup %518 }
 0x218   :  { %v263_v40 = vpack.c.bf16 %v519_v39, %v517_v38 }
 0x21a   :  { %481 = vmatmul.mubr.bf16.vlgmr.msra.gmra.mrb[4].mxu0 %v263_v40 }
 0x2ed   :  { %v369_v42 = vpop.f32.mrb[4].mxu0 }
 0x2ee   :  { %v370_v43 = vadd.f32 %v409_v41, %v369_v42  ;;  %v482_v44 = vpop.f32.mrb[5].mxu0 }
 0x2ef   :  { %v372_v45 = vpop.f32.mrb[6].mxu0 }
 0x2f0   :  { %376 = vst [vmem:[#allocation10] sm:$0xff] %v370_v43  ;;  %v373_v46 = vadd.f32 %v409_v41, %v372_v45  ;;  %v483_v47 = vpop.f32.mrb[7].mxu0 }
 0x2f2   :  { %377 = vst [vmem:[#allocation10 + $0x8] sm:$0xff] %v373_v46 }
 0x2f3   :  { %619 = shalt.err (!%p616_p8)
}
 0x2f4   :  { %s620_s14 = scalar_lea.hbm %s810_s7, 256 }
 0x2f5   :  { %p621_p9 = scmp.ne.s32.totalorder %s810_s7, %s620_s14  ;;  %p624_p10 = scmp.lt.u32.totalorder %s620_s14, %s810_s7 }
 0x2f7   :  { %p626_p11 = pnand %p624_p10, %p621_p9 }
 0x2f9   :  { %629 = shalt.err (!%p626_p11)
}
 0x2fa   :  { %389 = dma.vmem_to_hbm [thread:$0]  %s384_s10, 256, %s810_s7, [#allocation4], %s642_s1, %s642_s1, %s643_s25  }
 0x2fb   :  { %636 = dma.done.wait [#allocation4], 256  }
 0x2fc   :  { %637 = vsyncadd [#allocation4], 4294967040 }
 0x2fd   :  { %393 = vsyncpa [#allocation3], 1 }
 0x2fe   :  { %394 = vsyncpa [#allocation6], 1 }
 0x2ff   :  { %395 = vsyncpa [#allocation9], 1 }
 0x300   :  { %396 = vsyncpa [#allocation4], 1 }

</bundles_post_ra>
